<compile_context>
chip_gen: v7x
topology: tpu7x:2x2x1
jax: 0.10.0
libtpu: 0.0.40
codegen_flags: <defaults>
</compile_context>

<pallas_src>
import functools
import math

import jax
import jax.numpy as jnp
from jax.experimental import pallas as pl
from jax.experimental.pallas import tpu as pltpu


# --------------------------------------------------------------------------- #
# Kernels
# --------------------------------------------------------------------------- #
def _sdpa_kernel(q_ref, k_ref, v_ref, out_ref, attn_ref, *, scale, mxu_dtype):
    """General path. Blocks: q (Bt, Lt, D), k (Bt, T, D), v (Bt, T, Dv)."""
    # Fold 1/sqrt(D) into q (Lt*D elements) rather than the (Lt, T) scores.
    q = (q_ref[...].astype(jnp.float32) * scale).astype(mxu_dtype)
    k = k_ref[...].astype(mxu_dtype)

    # scores (Bt, Lt, T) = q @ keys^T, f32 accumulation on the MXU.
    s = jnp.einsum('bqd,bkd->bqk', q, k, preferred_element_type=jnp.float32)

    # Numerically-stable softmax over the key axis (dim=2), in f32.
    m = jnp.max(s, axis=-1, keepdims=True)
    e = jnp.exp(s - m)
    denom = jnp.sum(e, axis=-1, keepdims=True)
    # Exact reciprocal: only Bt*Lt elements, and the attention is user-visible.
    p = e * pl.reciprocal(denom, approx=False)

    # attended (Bt, Lt, Dv) = attention @ values.
    # Both operands in mxu_dtype (bf16 on the fast path), f32 accumulation.
    out = jnp.einsum('bqk,bkd->bqd',
                     p.astype(mxu_dtype), v_ref[...].astype(mxu_dtype),
                     preferred_element_type=jnp.float32)

    if attn_ref is not None:
        attn_ref[...] = p.astype(attn_ref.dtype)
    out_ref[...] = out.astype(out_ref.dtype)


def _sdpa_decode_kernel(q_ref, k_ref, v_ref, out_ref, attn_ref, *, scale):
    """Decode path (Lq == 1). Blocks: q (Bt, D), k (Bt, T, D), v (Bt, T, Dv);
    outputs (Bt, Dv) and (Bt, T) -- batch rides the sublane axis, so vregs and
    stores are ~8x denser than (Bt, 1, small) blocks.  Per batch element the
    work is a matvec, so VPU multiply + XLU reduce (all f32) instead of MXU."""
    q = q_ref[...].astype(jnp.float32) * scale          # (Bt, D)
    k = k_ref[...].astype(jnp.float32)                   # (Bt, T, D)
    v = v_ref[...].astype(jnp.float32)                   # (Bt, T, Dv)

    s = jnp.sum(q[:, None, :] * k, axis=-1)              # (Bt, T)
    m = jnp.max(s, axis=-1, keepdims=True)
    e = jnp.exp(s - m)
    denom = jnp.sum(e, axis=-1, keepdims=True)
    p = e * pl.reciprocal(denom, approx=False)

    out = jnp.sum(p[:, :, None] * v, axis=1)              # (Bt, Dv)

    if attn_ref is not None:
        attn_ref[...] = p.astype(attn_ref.dtype)
    out_ref[...] = out.astype(out_ref.dtype)


# --------------------------------------------------------------------------- #
# Tiling / VMEM budgeting
# --------------------------------------------------------------------------- #
def _vmem_capacity_bytes():
    """Generation-aware VMEM capacity (128 MiB v5e/v6e, 64 MiB per core v7x)."""
    try:
        cap = int(pltpu.get_tpu_info().vmem_capacity_bytes)
        if cap > 0:
            return cap
    except Exception:
        pass
    return 64 * 1024 * 1024   # conservative fallback = v7x per-core VMEM


def _choose_tiles(B, Lq, T, D, Dv, *, in_itemsize, out_itemsize, attn_itemsize,
                  budget, batch_tile=None, q_tile=None):
    """Pick (Bt, Lt) so the per-step footprint (double-buffered blocks plus the
    f32 softmax temporaries) fits `budget`, then ensure a megacore-friendly grid."""
    decode = (Lq == 1)

    def fits(bt, lt):
        inp = 2 * bt * (lt * D + T * D + T * Dv) * in_itemsize        # dbl-buffered inputs
        out = 2 * bt * lt * (Dv * out_itemsize + T * attn_itemsize)   # dbl-buffered outputs
        tmp = 3 * bt * lt * T * 4                                      # s / exp / p in f32
        if decode:
            tmp += 2 * bt * T * max(D, Dv) * 4                         # broadcast products
        return (inp + out + tmp) <= budget

    # ---- batch tile ----
    if batch_tile is not None:
        Bt = max(1, min(batch_tile, B))
    else:
        Bt = min(B, 64 if decode else 8)   # big decode batch tile: amortize step overhead
    if decode and Bt != B and Bt % 8 != 0:
        # 2-D decode blocks put batch on the sublane axis: tile must be a
        # multiple of 8 or the full batch.
        Bt = B if B <= 8 else max(8, (Bt // 8) * 8)

    # ---- query tile ----
    if decode:
        Lt = 1
    elif q_tile is not None:
        Lt = max(1, min(q_tile, Lq))
        if Lt != Lq and Lt % 8 != 0:
            Lt = Lq if Lq <= 8 else max(8, (Lt // 8) * 8)
    else:
        Lt = Lq if Lq <= 256 else 256

    # Shrink Lt first, then Bt, until the footprint fits the VMEM budget.
    while not fits(Bt, Lt):
        if (not decode) and Lq > 8 and Lt > 8:
            Lt = max(8, (Lt // 2) // 8 * 8)
            continue
        if decode:
            if B > 8 and Bt > 8:
                Bt = max(8, (Bt // 2) // 8 * 8)
                continue
        else:
            if Bt > 1:
                Bt = max(1, Bt // 2)
                continue
        break   # smallest legal tile; let the compiler handle the rest

    # Megacore (v7x: 2 TCs sharded over parallel axes): make sure there are
    # >= 2 grid steps when the problem is big enough to split.
    if batch_tile is None and q_tile is None:
        if pl.cdiv(B, Bt) * pl.cdiv(Lq, Lt) == 1:
            if decode:
                if B >= 16:
                    Bt = max(8, ((B // 2) + 7) // 8 * 8)
            elif B >= 2:
                Bt = (B + 1) // 2
            elif Lq >= 16:
                Lt = max(8, (Lq // 2) // 8 * 8)
    return Bt, Lt


# --------------------------------------------------------------------------- #
# Wrapper
# --------------------------------------------------------------------------- #
def scaled_dot_product_attention(query, keys, values, mask=None, *,
                                 batch_tile=None, q_tile=None,
                                 use_bf16_matmul=True, attn_dtype=None,
                                 return_attention=True):
    """query: [B, Lq, D], keys: [B, T, D], values: [B, T, Dv]
    -> (attended, attention); attended is squeezed on dim 1 when Lq == 1.

    use_bf16_matmul=True (default) runs both MXU matmuls with bf16 operands and
    f32 accumulation (v6e/v7x fast path); pass False for exact-f32 module
    numerics.  return_attention=False skips the (B, Lq, T) HBM writeback and
    returns (attended, None).  attn_dtype overrides the attention output dtype
    (e.g. jnp.bfloat16 to halve its HBM traffic)."""
    # TODO(synk): the module's truthy-mask branch (attention * mask followed by
    # a discarded renormalization) is not implemented; the reference call path
    # passes a falsy mask, which makes that branch a no-op.
    if mask is not None:
        raise NotImplementedError(
            "ScaledDotProductAttention Pallas kernel: only the falsy-mask "
            "(mask=None) path is implemented")

    B, Lq, D = query.shape
    Bk, T, Dk = keys.shape
    Bv, Tv, Dv = values.shape
    assert Dk == D and Bk == B and Bv == B and Tv == T

    scale = 1.0 / math.sqrt(float(D))
    decode = (Lq == 1)

    attn_dtype = query.dtype if attn_dtype is None else attn_dtype
    if query.dtype == jnp.bfloat16 or use_bf16_matmul:
        mxu_dtype = jnp.bfloat16
    else:
        mxu_dtype = jnp.float32

    cap = _vmem_capacity_bytes()
    vmem_limit = int(cap * 0.6)            # generation-aware, below physical VMEM
    Bt, Lt = _choose_tiles(
        B, Lq, T, D, Dv,
        in_itemsize=jnp.dtype(query.dtype).itemsize,
        out_itemsize=jnp.dtype(query.dtype).itemsize,
        attn_itemsize=(jnp.dtype(attn_dtype).itemsize if return_attention else 0),
        budget=cap // 2, batch_tile=batch_tile, q_tile=q_tile)

    if decode:
        body = functools.partial(_sdpa_decode_kernel, scale=scale)
    else:
        body = functools.partial(_sdpa_kernel, scale=scale, mxu_dtype=mxu_dtype)
    if return_attention:
        kernel = body
    else:
        kernel = lambda q, k, v, o: body(q, k, v, o, None)

    if decode:
        # ---- decode path: Lq collapsed, batch on sublanes ----
        q2 = query.reshape(B, D)
        n_b = pl.cdiv(B, Bt)
        if return_attention:
            out_shape = (jax.ShapeDtypeStruct((B, Dv), query.dtype),
                         jax.ShapeDtypeStruct((B, T), attn_dtype))
            out_specs = (pl.BlockSpec((Bt, Dv), lambda b: (b, 0)),
                         pl.BlockSpec((Bt, T), lambda b: (b, 0)))
        else:
            out_shape = jax.ShapeDtypeStruct((B, Dv), query.dtype)
            out_specs = pl.BlockSpec((Bt, Dv), lambda b: (b, 0))
        res = pl.pallas_call(
            kernel,
            out_shape=out_shape,
            grid_spec=pltpu.PrefetchScalarGridSpec(
                num_scalar_prefetch=0,
                grid=(n_b,),
                in_specs=[
                    pl.BlockSpec((Bt, D), lambda b: (b, 0)),
                    pl.BlockSpec((Bt, T, D), lambda b: (b, 0, 0)),
                    pl.BlockSpec((Bt, T, Dv), lambda b: (b, 0, 0)),
                ],
                out_specs=out_specs,
            ),
            compiler_params=pltpu.CompilerParams(
                dimension_semantics=("parallel",),
                vmem_limit_bytes=vmem_limit,
            ),
        )(q2, keys, values)
        if return_attention:
            attended, attention = res
            # Module shape for attention is (B, Lq, T); attended already matches
            # the .squeeze(1) of the reference (Lq == 1).
            return attended, attention.reshape(B, 1, T)
        return res, None

    # ---- general path (Lq > 1): batched MXU matmuls ----
    n_b, n_l = pl.cdiv(B, Bt), pl.cdiv(Lq, Lt)
    if return_attention:
        out_shape = (jax.ShapeDtypeStruct((B, Lq, Dv), query.dtype),
                     jax.ShapeDtypeStruct((B, Lq, T), attn_dtype))
        out_specs = (pl.BlockSpec((Bt, Lt, Dv), lambda b, l: (b, l, 0)),
                     pl.BlockSpec((Bt, Lt, T), lambda b, l: (b, l, 0)))
    else:
        out_shape = jax.ShapeDtypeStruct((B, Lq, Dv), query.dtype)
        out_specs = pl.BlockSpec((Bt, Lt, Dv), lambda b, l: (b, l, 0))
    res = pl.pallas_call(
        kernel,
        out_shape=out_shape,
        grid_spec=pltpu.PrefetchScalarGridSpec(
            num_scalar_prefetch=0,
            grid=(n_b, n_l),
            in_specs=[
                pl.BlockSpec((Bt, Lt, D), lambda b, l: (b, l, 0)),
                # K/V block index is constant along the inner l axis, so Pallas
                # only re-fetches them when the batch tile changes.
                # TODO(synk): pipeline_mode=pl.Buffered(1) on k/v would reclaim
                # their second buffer when VMEM-bound; left at default depth.
                pl.BlockSpec((Bt, T, D), lambda b, l: (b, 0, 0)),
                pl.BlockSpec((Bt, T, Dv), lambda b, l: (b, 0, 0)),
            ],
            out_specs=out_specs,
        ),
        compiler_params=pltpu.CompilerParams(
            dimension_semantics=("parallel", "parallel"),
            vmem_limit_bytes=vmem_limit,
        ),
    )(query, keys, values)
    if return_attention:
        attended, attention = res
    else:
        attended, attention = res, None
    # PyTorch's .squeeze(1) is a no-op here since Lq > 1.
    return attended, attention


# --------------------------------------------------------------------------- #
# Reference + self-test
# --------------------------------------------------------------------------- #
def _reference(query, keys, values):
    D = query.shape[-1]
    scale = 1.0 / jnp.sqrt(jnp.float32(D))
    s = jnp.einsum('bqd,bkd->bqk', query, keys) * scale
    p = jax.nn.softmax(s, axis=2)
    out = jnp.einsum('bqk,bkd->bqd', p, values)
    if query.shape[1] == 1:
        out = jnp.squeeze(out, axis=1)
    return out, p


if __name__ == "__main__":
    key = jax.random.PRNGKey(0)
    kq, kk, kv = jax.random.split(key, 3)

    # --- Test A: decoder shapes (query_dim = 32, Lq == 1) -> 2-D decode path.
    B, Lq, T, D = 2, 1, 8, 32
    query = jax.random.normal(kq, (B, Lq, D), dtype=jnp.float32)
    keys = jax.random.normal(kk, (B, T, D), dtype=jnp.float32)
    values = jax.random.normal(kv, (B, T, D), dtype=jnp.float32)

    attended, attention = scaled_dot_product_attention(query, keys, values, mask=None)
    jax.block_until_ready((attended, attention))
    out_ref, p_ref = _reference(query, keys, values)
    assert attended.shape == (B, D) and attention.shape == (B, Lq, T)
    assert jnp.allclose(attended, out_ref, atol=5e-3, rtol=5e-3)
    assert jnp.allclose(attention, p_ref, atol=5e-3, rtol=5e-3)

    # --- Test B: general path (Lq > 1, ragged batch), exact-f32 MXU operands.
    B2, Lq2, T2 = 3, 4, 16
    kq2, kk2, kv2 = jax.random.split(jax.random.PRNGKey(1), 3)
    q2 = jax.random.normal(kq2, (B2, Lq2, D), dtype=jnp.float32)
    k2 = jax.random.normal(kk2, (B2, T2, D), dtype=jnp.float32)
    v2 = jax.random.normal(kv2, (B2, T2, D), dtype=jnp.float32)
    out_ref2, p_ref2 = _reference(q2, k2, v2)

    att2, p2 = scaled_dot_product_attention(q2, k2, v2, mask=None,
                                            batch_tile=2, use_bf16_matmul=False)
    jax.block_until_ready((att2, p2))
    assert att2.shape == (B2, Lq2, D) and p2.shape == (B2, Lq2, T2)
    assert jnp.allclose(att2, out_ref2, atol=5e-3, rtol=5e-3)
    assert jnp.allclose(p2, p_ref2, atol=5e-3, rtol=5e-3)

    # --- Test C: same shapes, default bf16 MXU operands (v6e/v7x fast path).
    # Tolerance loosened for bf16 operand rounding (f32 accumulation).
    att3, p3 = scaled_dot_product_attention(q2, k2, v2, mask=None)
    jax.block_until_ready((att3, p3))
    assert att3.shape == (B2, Lq2, D) and p3.shape == (B2, Lq2, T2)
    assert jnp.allclose(att3, out_ref2, atol=5e-2, rtol=5e-2)
    assert jnp.allclose(p3, p_ref2, atol=5e-2, rtol=5e-2)

    # --- Test D: attention writeback skipped (HBM-roofline saving path).
    att4, p4 = scaled_dot_product_attention(q2, k2, v2, mask=None,
                                            use_bf16_matmul=False,
                                            return_attention=False)
    jax.block_until_ready(att4)
    assert p4 is None
    assert jnp.allclose(att4, out_ref2, atol=5e-3, rtol=5e-3)

    print("KERNEL_OK")
</pallas_src>

<mosaic_0001>
module attributes {stable_mosaic.version = 11 : i64} {
  func.func @_sdpa_decode_kernel(%arg0: i32, %arg1: memref<2x32xf32, #tpu.memory_space<vmem>>, %arg2: memref<2x8x32xf32, #tpu.memory_space<vmem>>, %arg3: memref<2x8x32xf32, #tpu.memory_space<vmem>>, %arg4: memref<2x32xf32, #tpu.memory_space<vmem>>, %arg5: memref<2x8xf32, #tpu.memory_space<vmem>>) attributes {dimension_semantics = [#tpu.dimension_semantics<parallel>], iteration_bounds = array<i64: 1>, scalar_prefetch = 0 : i64, scratch_operands = 0 : i64, tpu.core_type = #tpu.core_type<tc>, window_params = [{transform_indices = @transform_0, window_bounds = array<i64: 2, 32>}, {transform_indices = @transform_1, window_bounds = array<i64: 2, 8, 32>}, {transform_indices = @transform_2, window_bounds = array<i64: 2, 8, 32>}, {transform_indices = @transform_3, window_bounds = array<i64: 2, 32>}, {transform_indices = @transform_4, window_bounds = array<i64: 2, 8>}]} {
    %c0 = arith.constant 0 : index
    %c0_0 = arith.constant 0 : index
    %0 = vector.load %arg1[%c0, %c0_0] : memref<2x32xf32, #tpu.memory_space<vmem>>, vector<2x32xf32>
    %cst = arith.constant 0.176776692 : f32
    %1 = vector.broadcast %cst : f32 to vector<2x32xf32>
    %2 = arith.mulf %0, %1 : vector<2x32xf32>
    %c0_1 = arith.constant 0 : index
    %c0_2 = arith.constant 0 : index
    %c0_3 = arith.constant 0 : index
    %3 = vector.load %arg2[%c0_1, %c0_2, %c0_3] : memref<2x8x32xf32, #tpu.memory_space<vmem>>, vector<2x8x32xf32>
    %c0_4 = arith.constant 0 : index
    %c0_5 = arith.constant 0 : index
    %c0_6 = arith.constant 0 : index
    %4 = vector.load %arg3[%c0_4, %c0_5, %c0_6] : memref<2x8x32xf32, #tpu.memory_space<vmem>>, vector<2x8x32xf32>
    %5 = vector.shape_cast %2 : vector<2x32xf32> to vector<2x1x32xf32>
    %6 = vector.broadcast %5 : vector<2x1x32xf32> to vector<2x8x32xf32>
    %7 = arith.mulf %6, %3 : vector<2x8x32xf32>
    %cst_7 = arith.constant dense<0.000000e+00> : vector<2x8xf32>
    %8 = vector.multi_reduction <add>, %7, %cst_7 [2] : vector<2x8x32xf32> to vector<2x8xf32>
    %cst_8 = arith.constant dense<0xFF800000> : vector<2xf32>
    %9 = vector.multi_reduction <maximumf>, %8, %cst_8 [1] : vector<2x8xf32> to vector<2xf32>
    %10 = vector.shape_cast %9 : vector<2xf32> to vector<2x1xf32>
    %11 = vector.broadcast %10 : vector<2x1xf32> to vector<2x8xf32>
    %12 = arith.subf %8, %11 : vector<2x8xf32>
    %13 = math.exp %12 : vector<2x8xf32>
    %cst_9 = arith.constant dense<0.000000e+00> : vector<2xf32>
    %14 = vector.multi_reduction <add>, %13, %cst_9 [1] : vector<2x8xf32> to vector<2xf32>
    %15 = vector.shape_cast %14 : vector<2xf32> to vector<2x1xf32>
    %16 = tpu.reciprocal %15 : vector<2x1xf32> -> vector<2x1xf32>
    %17 = vector.broadcast %16 : vector<2x1xf32> to vector<2x8xf32>
    %18 = arith.mulf %13, %17 : vector<2x8xf32>
    %19 = vector.shape_cast %18 : vector<2x8xf32> to vector<2x8x1xf32>
    %20 = vector.broadcast %19 : vector<2x8x1xf32> to vector<2x8x32xf32>
    %21 = arith.mulf %20, %4 : vector<2x8x32xf32>
    %cst_10 = arith.constant dense<0.000000e+00> : vector<2x32xf32>
    %22 = vector.multi_reduction <add>, %21, %cst_10 [1] : vector<2x8x32xf32> to vector<2x32xf32>
    %c0_11 = arith.constant 0 : index
    %c0_12 = arith.constant 0 : index
    %23 = vector.load %arg5[%c0_11, %c0_12] : memref<2x8xf32, #tpu.memory_space<vmem>>, vector<2x8xf32>
    tpu.vector_store %arg5[%c0_11, %c0_12], %18 {strides = array<i32>} : memref<2x8xf32, #tpu.memory_space<vmem>>, vector<2x8xf32>,
    %c0_13 = arith.constant 0 : index
    %c0_14 = arith.constant 0 : index
    %24 = vector.load %arg4[%c0_13, %c0_14] : memref<2x32xf32, #tpu.memory_space<vmem>>, vector<2x32xf32>
    tpu.vector_store %arg4[%c0_13, %c0_14], %22 {strides = array<i32>} : memref<2x32xf32, #tpu.memory_space<vmem>>, vector<2x32xf32>,
    return
  }
  func.func @transform_0(%arg0: i32) -> (i32, i32) {
    %c0_i32 = arith.constant 0 : i32
    %c0_i32_0 = arith.constant 0 : i32
    return %arg0, %c0_i32 : i32, i32
  }
  func.func @transform_1(%arg0: i32) -> (i32, i32, i32) {
    %c0_i32 = arith.constant 0 : i32
    %c0_i32_0 = arith.constant 0 : i32
    %c0_i32_1 = arith.constant 0 : i32
    return %arg0, %c0_i32, %c0_i32_0 : i32, i32, i32
  }
  func.func @transform_2(%arg0: i32) -> (i32, i32, i32) {
    %c0_i32 = arith.constant 0 : i32
    %c0_i32_0 = arith.constant 0 : i32
    %c0_i32_1 = arith.constant 0 : i32
    return %arg0, %c0_i32, %c0_i32_0 : i32, i32, i32
  }
  func.func @transform_3(%arg0: i32) -> (i32, i32) {
    %c0_i32 = arith.constant 0 : i32
    %c0_i32_0 = arith.constant 0 : i32
    return %arg0, %c0_i32 : i32, i32
  }
  func.func @transform_4(%arg0: i32) -> (i32, i32) {
    %c0_i32 = arith.constant 0 : i32
    %c0_i32_0 = arith.constant 0 : i32
    return %arg0, %c0_i32 : i32, i32
  }
}

</mosaic_0001>

<bundles_post_ra>
// kernel: tpu_custom_call.1
= control target key start
LH: loop header
LB: loop body
LE: loop exit
PB: predicated region body
PF: predicated region fallthrough
CT: control target
= control target key end

     0   :  { %10 = vsyncpa [#allocation3], 0  ;;  %s503_s0 = inlined_call_operand.hbm [shape: f32[2,32], index: 0, kind: input, shape index: {}]   ;;  %s504_s1 = inlined_call_operand.hbm [shape: f32[2,8,32], index: 1, kind: input, shape index: {}]   ;;  %s505_s2 = inlined_call_operand.hbm [shape: f32[2,8,32], index: 2, kind: input, shape index: {}]   ;;  %s506_s3 = inlined_call_operand.hbm [shape: f32[2,32], index: 3, kind: output, shape index: {0}]   ;;  %s507_s4 = inlined_call_operand.hbm [shape: f32[2,8], index: 4, kind: output, shape index: {1}]  }
   0x1   :  { %11 = vsyncpa [#allocation6], 0 }
   0x2   :  { %12 = vsyncpa [#allocation4], 0 }
   0x3   :  { %13 = vsyncpa [#allocation10], 0  ;;  %s384_s15 = smov [#allocation5]   ;;  %s266_s19 = scalar_lea.hbm %s504_s1, 256 }
   0x4   :  { %s29_s16 = sshll.u32 %s384_s15, 4  ;;  %p267_p0 = scmp.ne.s32.totalorder %s504_s1, %s266_s19  ;;  %s30_s16 = int_to_ptr.vmem [resolvable:$true] %s29_s16 }
   0x5   :  { %p270_p1 = scmp.lt.u32.totalorder %s266_s19, %s504_s1 }
   0x7   :  { %p272_p2 = pnand %p270_p1, %p267_p0 }
   0x9   :  { %275 = shalt.err (!%p272_p2)
}
   0xa   :  { %s276_s24 = scalar_lea.vmem %s30_s16, 256  ;;  %p281_p4 = scmp.lt.s32.totalorder %s30_s16, %s30_s16 }
   0xb   :  { %p277_p3 = scmp.ne.s32.totalorder %s30_s16, %s276_s24  ;;  %p282_p5 = scmp.lt.s32.totalorder %s276_s24, %s276_s24 }
   0xd   :  { %p283_p6 = por %p282_p5, %p281_p4 }
   0xf   :  { %p284_p7 = pnand %p283_p6, %p277_p3 }
  0x11   :  { %287 = shalt.err (!%p284_p7)
}
  0x12   :  { %s385_s25 = smov 128   ;;  %s386_s26 = smov 8  }
  0x13   :  { %35 = dma.hbm_to_vmem [thread:$0]  %s504_s1, 256, %s30_s16, [#allocation6], %s385_s25, %s385_s25, %s386_s26  }
  0x14   :  { %s387_s29 = smov [#allocation2]   ;;  %s388_s5 = smov [#allocation7]  }
  0x15   :  { %s20_s30 = sshll.u32 %s387_s29, 4  ;;  %s41_s6 = sshll.u32 %s388_s5, 4  ;;  %s21_s30 = int_to_ptr.vmem [resolvable:$true] %s20_s30  ;;  %s42_s6 = int_to_ptr.vmem [resolvable:$true] %s41_s6 }
  0x16   :  { %s288_s9 = scalar_lea.hbm %s503_s0, 32 }
  0x17   :  { %p289_p8 = scmp.ne.s32.totalorder %s503_s0, %s288_s9  ;;  %p292_p9 = scmp.lt.u32.totalorder %s288_s9, %s503_s0 }
  0x19   :  { %p294_p10 = pnand %p292_p9, %p289_p8 }
  0x1b   :  { %297 = shalt.err (!%p294_p10)
}
  0x1c   :  { %s298_s1 = scalar_lea.vmem %s21_s30, 32  ;;  %p303_p12 = scmp.lt.s32.totalorder %s21_s30, %s21_s30 }
  0x1d   :  { %p299_p11 = scmp.ne.s32.totalorder %s21_s30, %s298_s1  ;;  %p304_p13 = scmp.lt.s32.totalorder %s298_s1, %s298_s1 }
  0x1f   :  { %p305_p0 = por %p304_p13, %p303_p12 }
  0x21   :  { %p306_p1 = pnand %p305_p0, %p299_p11 }
  0x23   :  { %309 = shalt.err (!%p306_p1)
}
  0x24   :  { %23 = dma.hbm_to_vmem [thread:$0]  %s503_s0, 32, %s21_s30, [#allocation3]  }
  0x25   :  { %s310_s18 = scalar_lea.hbm %s505_s2, 256 }
  0x26   :  { %p311_p2 = scmp.ne.s32.totalorder %s505_s2, %s310_s18  ;;  %p314_p3 = scmp.lt.u32.totalorder %s310_s18, %s505_s2 }
  0x28   :  { %p316_p4 = pnand %p314_p3, %p311_p2 }
  0x2a   :  { %319 = shalt.err (!%p316_p4)
}
  0x2b   :  { %s320_s23 = scalar_lea.vmem %s42_s6, 256  ;;  %p325_p6 = scmp.lt.s32.totalorder %s42_s6, %s42_s6 }
  0x2c   :  { %p321_p5 = scmp.ne.s32.totalorder %s42_s6, %s320_s23  ;;  %p326_p7 = scmp.lt.s32.totalorder %s320_s23, %s320_s23 }
  0x2e   :  { %p327_p8 = por %p326_p7, %p325_p6 }
  0x30   :  { %p328_p9 = pnand %p327_p8, %p321_p5 }
  0x32   :  { %331 = shalt.err (!%p328_p9)
}
  0x33   :  { %47 = dma.hbm_to_vmem [thread:$0]  %s505_s2, 256, %s42_s6, [#allocation6], %s385_s25, %s385_s25, %s386_s26  }
  0x34   :  { %376 = dma.done.wait [#allocation3], 32  }
  0x35   :  { %377 = vsyncadd [#allocation3], 4294967264 }
  0x36   :  { %378 = dma.done.wait [#allocation6], 512  }
  0x37   :  { %379 = vsyncadd [#allocation6], 4294966784  ;;  %v67_v0 = vlaneseq  ;;  %v389_v1 = vmov 1966171168   ;;  %v57_v8 = vld [vmem:[#allocation2] sm:$0x3] }
  0x38   :  { %v65_v2 = vunpack.c.l.s4 %v389_v1  ;;  %v58_v9 = vmul.f32 0.17677669, %v57_v8  ;;  %v59_v14 = vld [vmem:[#allocation5] sm:$0xff]  ;;  %vm98_vm0 = vcmask 261120   ;;  %v60_v17 = vld [vmem:[#allocation5 + $0x8] sm:$0xff]  ;;  %vm117_vm1 = vcmask 1041409  }
  0x39   :  { %v68_v3 = vshrl.u32 %v67_v0, 7  ;;  %v108_v4 = vand.u32 127, %v67_v0  ;;  %vm120_vm2 = vcmask 58368   ;;  %v390_v29 = vmov 0   ;;  %v61_v52 = vld [vmem:[#allocation7] sm:$0xff]  ;;  %v62_v55 = vld [vmem:[#allocation7 + $0x8] sm:$0xff] }
  0x3a   :  { %v66_v5 = vunpack.c.0.s8 %v65_v2  ;;  %259 = vset.pattern.permute.xlu0 %v390_v29  ;;  %258 = vset.pattern.permute.xlu1 %v390_v29  ;;  %s391_s2 = smov [#allocation9]  }
  0x3b   :  { %v460_v6 = vsub.s32 %v108_v4, %v68_v3  ;;  %v88_v11 = vsub.s32 0, %v68_v3  ;;  %v131_v30 = vsub.s32 1, %v68_v3  ;;  %s235_s25 = sshll.u32 %s391_s2, 4  ;;  %s236_s25 = int_to_ptr.vmem [resolvable:$true] %s235_s25 }
  0x3c   :  { %v69_v7 = vsub.s32 %v66_v5, %v68_v3  ;;  %s332_s26 = scalar_lea.vmem %s236_s25, 32  ;;  %p337_p11 = scmp.lt.s32.totalorder %s236_s25, %s236_s25 }
  0x3d   :  { %p333_p10 = scmp.ne.s32.totalorder %s236_s25, %s332_s26  ;;  %p338_p12 = scmp.lt.s32.totalorder %s332_s26, %s332_s26 }
  0x3e   :  { %v70_v10 = vrot.slane %v58_v9, %v69_v7 }
  0x3f   :  { %p339_p13 = por %p338_p12, %p337_p11 }
  0x40   :  { %v78_v12 = vrot.slane %v70_v10, %v69_v7  ;;  %v71_v13 = vcombine.high %v70_v10, %v70_v10 }
  0x41   :  { %p340_p0 = pnand %p339_p13, %p333_p10 }
  0x42   :  { %v89_v15 = vrot.slane %v78_v12, %v88_v11  ;;  %v85_v16 = vrot.slane %v71_v13, %v69_v7 }
  0x44   :  { %v96_v18 = vmul.f32 %v89_v15, %v59_v14  ;;  %v93_v19 = vrot.slane %v85_v16, %v88_v11 }
  0x46   :  { %v99_v20 = vsel %vm98_vm0, %v96_v18, 0.0  ;;  %v97_v21 = vmul.f32 %v93_v19, %v60_v17 }
  0x47   :  { %100 = vadd.xlane.f32.xlu0 %v99_v20 }
  0x48   :  { %v102_v22 = vsel %vm98_vm0, %v97_v21, 0.0 }
  0x4b   :  { %103 = vadd.xlane.f32.xlu0 %v102_v22 }
  0xd4   :  { %v101_v23 = vpop.xlane.xlu0 %100 }
  0xd5   :  { %v112_v25 = vrot.slane %v101_v23, %v460_v6 }
  0xd8   :  { %v104_v24 = vpop.xlane.xlu0 %103 }
  0xd9   :  { %v116_v26 = vrot.slane %v104_v24, %v460_v6 }
  0xdb   :  { %v118_v27 = vsel %vm117_vm1, %v116_v26, %v112_v25 }
  0xdc   :  { %v121_v28 = vsel %vm120_vm2, %v118_v27, -inf }
  0xdd   :  { %122 = vmax.xlane.f32.xlu1 %v121_v28 }
 0x16a   :  { %v123_v31 = vpop.xlane.xlu1 %122 }
 0x16b   :  { %v128_v32 = vrot.slane %v123_v31, %v88_v11  ;;  %v132_v33 = vrot.slane %v123_v31, %v131_v30 }
 0x16d   :  { %v135_v34 = vsub.f32 %v101_v23, %v128_v32  ;;  %v136_v35 = vsub.f32 %v104_v24, %v132_v33 }
 0x16f   :  { %v137_v36 = vmul.f32 1.442695, %v135_v34  ;;  %v139_v37 = vmul.f32 1.442695, %v136_v35 }
 0x171   :  { %260 = vpow2.f32 %v137_v36 }
 0x172   :  { %262 = vpow2.f32 %v139_v37 }
 0x17b   :  { %v261_v38 = vpop.eup %260 }
 0x17c   :  { %v263_v39 = vpop.eup %262  ;;  %144 = vperm.xlu1 %258, %v261_v38  }
 0x17d   :  { %147 = vperm.xlu0 %259, %v263_v39  }
 0x1fb   :  { %v145_v40 = vpop.permute.xlu1 %144 }
 0x1fc   :  { %v148_v41 = vpop.permute.xlu0 %147  ;;  %v152_v42 = vrot.slane %v145_v40, %v460_v6 }
 0x1fd   :  { %v156_v43 = vrot.slane %v148_v41, %v460_v6 }
 0x1ff   :  { %v157_v44 = vsel %vm117_vm1, %v156_v43, %v152_v42 }
 0x200   :  { %v159_v45 = vsel %vm120_vm2, %v157_v44, 0.0 }
 0x201   :  { %160 = vadd.xlane.f32.xlu1 %v159_v45 }
 0x28e   :  { %v161_v46 = vpop.xlane.xlu1 %160 }
 0x28f   :  { %264 = vrcp.f32 %v161_v46 }
 0x299   :  { %v265_v47 = vpop.eup %264 }
 0x29a   :  { %v167_v48 = vrot.slane %v265_v47, %v88_v11  ;;  %v171_v50 = vrot.slane %v265_v47, %v131_v30 }
 0x29c   :  { %v174_v49 = vmul.f32 %v261_v38, %v167_v48  ;;  %v175_v51 = vmul.f32 %v263_v39, %v171_v50 }
 0x29e   :  { %178 = vperm.xlu0 %259, %v174_v49  }
 0x2a2   :  { %183 = vperm.xlu0 %259, %v175_v51  }
 0x31d   :  { %v179_v53 = vpop.permute.xlu0 %178 }
 0x31e   :  { %v186_v54 = vmul.f32 %v179_v53, %v61_v52  ;;  %v205_v59 = vrot.slane %v179_v53, %v460_v6 }
 0x320   :  { %v188_v56 = vsel %vm98_vm0, %v186_v54, 0.0 }
 0x321   :  { %v189_v57 = vrot.slane %v188_v56, 4  ;;  %v184_v58 = vpop.permute.xlu0 %183 }
 0x322   :  { %v187_v60 = vmul.f32 %v184_v58, %v62_v55  ;;  %v209_v61 = vrot.slane %v184_v58, %v460_v6 }
 0x323   :  { %v190_v62 = vadd.f32 %v189_v57, %v188_v56 }
 0x324   :  { %v195_v63 = vsel %vm98_vm0, %v187_v60, 0.0  ;;  %v210_v0 = vsel %vm117_vm1, %v209_v61, %v205_v59 }
 0x325   :  { %v191_v1 = vrot.slane %v190_v62, 2  ;;  %v196_v2 = vrot.slane %v195_v63, 4  ;;  %212 = vst.msk [vmem:[#allocation9] sm:$0x3] %vm120_vm2, %v210_v0 }
 0x326   :  { %343 = shalt.err (!%p340_p0)
}
 0x327   :  { %s344_s29 = scalar_lea.hbm %s507_s4, 32 }
 0x328   :  { %p345_p1 = scmp.ne.s32.totalorder %s507_s4, %s344_s29  ;;  %p348_p2 = scmp.lt.u32.totalorder %s344_s29, %s507_s4 }
 0x32a   :  { %p350_p3 = pnand %p348_p2, %p345_p1 }
 0x32c   :  { %353 = shalt.err (!%p350_p3)
}
 0x32d   :  { %238 = dma.vmem_to_hbm [thread:$0]  %s236_s25, 32, %s507_s4, [#allocation10]   ;;  %v192_v3 = vadd.f32 %v191_v1, %v190_v62  ;;  %v197_v4 = vadd.f32 %v196_v2, %v195_v63  ;;  %vm217_vm3 = vcmask 254976  }
 0x32e   :  { %s392_s10 = smov [#allocation8]  }
 0x32f   :  { %v198_v5 = vrot.slane %v197_v4, 2  ;;  %v193_v6 = vrot.slane %v192_v3, 1  ;;  %s225_s11 = sshll.u32 %s392_s10, 4  ;;  %s226_s11 = int_to_ptr.vmem [resolvable:$true] %s225_s11 }
 0x330   :  { %s354_s12 = scalar_lea.vmem %s226_s11, 32  ;;  %p359_p5 = scmp.lt.s32.totalorder %s226_s11, %s226_s11 }
 0x331   :  { %v199_v7 = vadd.f32 %v198_v5, %v197_v4  ;;  %v194_v10 = vadd.f32 %v193_v6, %v192_v3  ;;  %p355_p4 = scmp.ne.s32.totalorder %s226_s11, %s354_s12  ;;  %p360_p6 = scmp.lt.s32.totalorder %s354_s12, %s354_s12 }
 0x333   :  { %v200_v8 = vrot.slane %v199_v7, 1  ;;  %p361_p7 = por %p360_p6, %p359_p5 }
 0x335   :  { %v201_v9 = vadd.f32 %v200_v8, %v199_v7  ;;  %p362_p8 = pnand %p361_p7, %p355_p4 }
 0x337   :  { %v215_v11 = vsel %vm117_vm1, %v201_v9, %v194_v10 }
 0x338   :  { %218 = vst.msk [vmem:[#allocation8] sm:$0x3] %vm217_vm3, %v215_v11 }
 0x339   :  { %365 = shalt.err (!%p362_p8)
}
 0x33a   :  { %s366_s1 = scalar_lea.hbm %s506_s3, 32 }
 0x33b   :  { %p367_p9 = scmp.ne.s32.totalorder %s506_s3, %s366_s1  ;;  %p370_p10 = scmp.lt.u32.totalorder %s366_s1, %s506_s3 }
 0x33d   :  { %p372_p11 = pnand %p370_p10, %p367_p9 }
 0x33f   :  { %375 = shalt.err (!%p372_p11)
}
 0x340   :  { %228 = dma.vmem_to_hbm [thread:$0]  %s226_s11, 32, %s506_s3, [#allocation4]  }
 0x341   :  { %380 = dma.done.wait [#allocation4], 32  }
 0x342   :  { %381 = vsyncadd [#allocation4], 4294967264 }
 0x343   :  { %382 = dma.done.wait [#allocation10], 32  }
 0x344   :  { %383 = vsyncadd [#allocation10], 4294967264 }
 0x345   :  { %245 = vsyncpa [#allocation3], 1 }
 0x346   :  { %246 = vsyncpa [#allocation6], 1 }
 0x347   :  { %247 = vsyncpa [#allocation4], 1 }
 0x348   :  { %248 = vsyncpa [#allocation10], 1 }

</bundles_post_ra>
